<compile_context>
chip_gen: v6e
topology: v6e:2x2x1
jax: 0.10.0
libtpu: 0.0.40
codegen_flags: <defaults>
</compile_context>

<pallas_src>
import functools

import jax
import jax.numpy as jnp
from jax.experimental import pallas as pl
from jax.experimental.pallas import tpu as pltpu

K = 3  # kernel_size
S = 3  # stride (MaxPool2d default: stride = kernel_size)


def _ceil_to(x: int, m: int) -> int:
    return ((x + m - 1) // m) * m


def _maxpool_taps_kernel(x_ref, o_ref, *, num_taps):
    """x_ref: (num_taps, t_hw, t_b) VMEM tile; o_ref: (t_hw, t_b) VMEM tile.

    Each tap x_ref[t] is a full, lane-dense (t_hw, t_b) slab. The 3x3 window max
    is an elementwise maximum across taps (VPU vmax) followed by one unmasked
    full-block store.
    """
    acc = x_ref[0]
    for t in range(1, num_taps):
        acc = jnp.maximum(acc, x_ref[t])
    o_ref[...] = acc


def _reduce_window_ref(x):
    if jnp.issubdtype(x.dtype, jnp.floating):
        init = -jnp.inf
    else:
        init = jnp.iinfo(x.dtype).min
    return jax.lax.reduce_window(
        x, jnp.asarray(init, x.dtype), jax.lax.max,
        window_dimensions=(1, 1, K, K),
        window_strides=(1, 1, S, S),
        padding="VALID",
    )


def maxpool2d_3x3(x, *, min_pallas_out_elems=1024):
    """Equivalent of torch.nn.MaxPool2d(kernel_size=3, ceil_mode=False) on NCHW."""
    N, C, H, W = x.shape
    Ho = (H - K) // S + 1 if H >= K else 0
    Wo = (W - K) // S + 1 if W >= K else 0
    if Ho <= 0 or Wo <= 0:
        return jnp.zeros((N, C, max(Ho, 0), max(Wo, 0)), x.dtype)

    B = N * C
    HW = Ho * Wo
    if B * HW < min_pallas_out_elems:
        # Fixed pallas_call + DMA overhead dwarfs the work at this scale.
        return _reduce_window_ref(x)

    # ---- wrapper-side layout plumbing (HBM-side, handled by XLA) ----
    # Crop to a multiple of the window, space-to-depth, and put B on lanes.
    xc = x[:, :, : Ho * S, : Wo * S].reshape(B, Ho, K, Wo, K)
    taps = jnp.transpose(xc, (2, 4, 1, 3, 0)).reshape(K * K, HW, B)

    # ---- tiling: sublane axis = Ho*Wo, lane axis = B ----
    t_hw = min(_ceil_to(HW, 8), 512)
    t_b = min(_ceil_to(B, 128), 512)
    HWp = _ceil_to(HW, t_hw)
    Bp = _ceil_to(B, t_b)
    if (HWp, Bp) != (HW, B):
        # Padded rows/lanes only produce padded outputs, which are sliced off.
        taps = jnp.pad(taps, ((0, 0), (0, HWp - HW), (0, Bp - B)))

    out = pl.pallas_call(
        functools.partial(_maxpool_taps_kernel, num_taps=K * K),
        out_shape=jax.ShapeDtypeStruct((HWp, Bp), x.dtype),
        grid=(HWp // t_hw, Bp // t_b),
        in_specs=[pl.BlockSpec((K * K, t_hw, t_b), lambda i, j: (0, i, j))],
        out_specs=pl.BlockSpec((t_hw, t_b), lambda i, j: (i, j)),
        compiler_params=pltpu.CompilerParams(
            dimension_semantics=("parallel", "parallel"),
            vmem_limit_bytes=32 * 1024 * 1024,
        ),
    )(taps)

    out = out[:HW, :B]                                    # (Ho*Wo, B)
    return jnp.transpose(out, (1, 0)).reshape(N, C, Ho, Wo)


class MyModulePallas:
    """Mirror of the PyTorch My_moudle: forward(x) = MaxPool2d(kernel_size=3)(x)."""

    def __call__(self, x):
        return maxpool2d_3x3(x)


if __name__ == "__main__":
    my_module = MyModulePallas()

    # 1) Pallas path: small but large enough to exercise the tiled kernel.
    key = jax.random.PRNGKey(0)
    x_big = jax.random.normal(key, (2, 4, 48, 48), dtype=jnp.float32)
    out_big = jax.block_until_ready(my_module(x_big))
    ref_big = _reduce_window_ref(x_big)
    assert out_big.shape == (2, 4, 16, 16), out_big.shape
    assert jnp.allclose(out_big, ref_big), "Pallas maxpool mismatch vs reduce_window"

    # 2) Original demo shape (2, 1, 5, 5): takes the tiny-input fallback path.
    key2 = jax.random.PRNGKey(0)
    data = jax.random.normal(key2, (2 * 1 * 5 * 5,), dtype=jnp.float32)
    x_small = data.reshape(-1, 1, 5, 5)
    out_small = jax.block_until_ready(my_module(x_small))
    ref_small = _reduce_window_ref(x_small)
    assert out_small.shape == (2, 1, 1, 1), out_small.shape
    assert jnp.allclose(out_small, ref_small)

    print("KERNEL_OK")
</pallas_src>

<mosaic_0001>
module attributes {stable_mosaic.version = 11 : i64} {
  func.func @_maxpool_taps_kernel(%arg0: i32, %arg1: i32, %arg2: memref<9x256x128xf32, #tpu.memory_space<vmem>>, %arg3: memref<256x128xf32, #tpu.memory_space<vmem>>) attributes {dimension_semantics = [#tpu.dimension_semantics<parallel>, #tpu.dimension_semantics<parallel>], iteration_bounds = array<i64: 1, 1>, scalar_prefetch = 0 : i64, scratch_operands = 0 : i64, tpu.core_type = #tpu.core_type<tc>, window_params = [{transform_indices = @transform_0, window_bounds = array<i64: 9, 256, 128>}, {transform_indices = @transform_1, window_bounds = array<i64: 256, 128>}]} {
    %c0 = arith.constant 0 : index
    %c0_0 = arith.constant 0 : index
    %c0_1 = arith.constant 0 : index
    %0 = vector.load %arg2[%c0, %c0_0, %c0_1] : memref<9x256x128xf32, #tpu.memory_space<vmem>>, vector<1x256x128xf32>
    %1 = vector.shape_cast %0 : vector<1x256x128xf32> to vector<256x128xf32>
    %c1 = arith.constant 1 : index
    %c0_2 = arith.constant 0 : index
    %c0_3 = arith.constant 0 : index
    %2 = vector.load %arg2[%c1, %c0_2, %c0_3] : memref<9x256x128xf32, #tpu.memory_space<vmem>>, vector<1x256x128xf32>
    %3 = vector.shape_cast %2 : vector<1x256x128xf32> to vector<256x128xf32>
    %4 = arith.maximumf %1, %3 : vector<256x128xf32>
    %c2 = arith.constant 2 : index
    %c0_4 = arith.constant 0 : index
    %c0_5 = arith.constant 0 : index
    %5 = vector.load %arg2[%c2, %c0_4, %c0_5] : memref<9x256x128xf32, #tpu.memory_space<vmem>>, vector<1x256x128xf32>
    %6 = vector.shape_cast %5 : vector<1x256x128xf32> to vector<256x128xf32>
    %7 = arith.maximumf %4, %6 : vector<256x128xf32>
    %c3 = arith.constant 3 : index
    %c0_6 = arith.constant 0 : index
    %c0_7 = arith.constant 0 : index
    %8 = vector.load %arg2[%c3, %c0_6, %c0_7] : memref<9x256x128xf32, #tpu.memory_space<vmem>>, vector<1x256x128xf32>
    %9 = vector.shape_cast %8 : vector<1x256x128xf32> to vector<256x128xf32>
    %10 = arith.maximumf %7, %9 : vector<256x128xf32>
    %c4 = arith.constant 4 : index
    %c0_8 = arith.constant 0 : index
    %c0_9 = arith.constant 0 : index
    %11 = vector.load %arg2[%c4, %c0_8, %c0_9] : memref<9x256x128xf32, #tpu.memory_space<vmem>>, vector<1x256x128xf32>
    %12 = vector.shape_cast %11 : vector<1x256x128xf32> to vector<256x128xf32>
    %13 = arith.maximumf %10, %12 : vector<256x128xf32>
    %c5 = arith.constant 5 : index
    %c0_10 = arith.constant 0 : index
    %c0_11 = arith.constant 0 : index
    %14 = vector.load %arg2[%c5, %c0_10, %c0_11] : memref<9x256x128xf32, #tpu.memory_space<vmem>>, vector<1x256x128xf32>
    %15 = vector.shape_cast %14 : vector<1x256x128xf32> to vector<256x128xf32>
    %16 = arith.maximumf %13, %15 : vector<256x128xf32>
    %c6 = arith.constant 6 : index
    %c0_12 = arith.constant 0 : index
    %c0_13 = arith.constant 0 : index
    %17 = vector.load %arg2[%c6, %c0_12, %c0_13] : memref<9x256x128xf32, #tpu.memory_space<vmem>>, vector<1x256x128xf32>
    %18 = vector.shape_cast %17 : vector<1x256x128xf32> to vector<256x128xf32>
    %19 = arith.maximumf %16, %18 : vector<256x128xf32>
    %c7 = arith.constant 7 : index
    %c0_14 = arith.constant 0 : index
    %c0_15 = arith.constant 0 : index
    %20 = vector.load %arg2[%c7, %c0_14, %c0_15] : memref<9x256x128xf32, #tpu.memory_space<vmem>>, vector<1x256x128xf32>
    %21 = vector.shape_cast %20 : vector<1x256x128xf32> to vector<256x128xf32>
    %22 = arith.maximumf %19, %21 : vector<256x128xf32>
    %c8 = arith.constant 8 : index
    %c0_16 = arith.constant 0 : index
    %c0_17 = arith.constant 0 : index
    %23 = vector.load %arg2[%c8, %c0_16, %c0_17] : memref<9x256x128xf32, #tpu.memory_space<vmem>>, vector<1x256x128xf32>
    %24 = vector.shape_cast %23 : vector<1x256x128xf32> to vector<256x128xf32>
    %25 = arith.maximumf %22, %24 : vector<256x128xf32>
    %c0_18 = arith.constant 0 : index
    %c0_19 = arith.constant 0 : index
    %26 = vector.load %arg3[%c0_18, %c0_19] : memref<256x128xf32, #tpu.memory_space<vmem>>, vector<256x128xf32>
    tpu.vector_store %arg3[%c0_18, %c0_19], %25 {strides = array<i32>} : memref<256x128xf32, #tpu.memory_space<vmem>>, vector<256x128xf32>,
    return
  }
  func.func @transform_0(%arg0: i32, %arg1: i32) -> (i32, i32, i32) {
    %c0_i32 = arith.constant 0 : i32
    %c0_i32_0 = arith.constant 0 : i32
    return %c0_i32, %arg0, %arg1 : i32, i32, i32
  }
  func.func @transform_1(%arg0: i32, %arg1: i32) -> (i32, i32) {
    %c0_i32 = arith.constant 0 : i32
    return %arg0, %arg1 : i32, i32
  }
}

</mosaic_0001>

<bundles_post_ra>
// kernel: tpu_custom_call.1
= control target key start
LH: loop header
LB: loop body
LE: loop exit
PB: predicated region body
PF: predicated region fallthrough
CT: control target
= control target key end

     0   :  { %6 = vsyncpa [#allocation3], 0  ;;  %s698_s0 = inlined_call_operand.hbm [shape: f32[9,256,128], index: 0, kind: input, shape index: {}]   ;;  %s699_s1 = inlined_call_operand.hbm [shape: f32[256,128], index: 1, kind: output, shape index: {}]  }
   0x1   :  { %7 = vsyncpa [#allocation4], 0  ;;  %s672_s6 = smov [#allocation2]  }
   0x2   :  { %s13_s7 = sshll.u32 %s672_s6, 4  ;;  %s14_s7 = int_to_ptr.vmem [resolvable:$true] %s13_s7 }
   0x3   :  { %s636_s8 = scalar_lea.vmem %s14_s7, 36864  ;;  %p641_p1 = scmp.lt.s32.totalorder %s14_s7, %s14_s7 }
   0x4   :  { %p637_p0 = scmp.ne.s32.totalorder %s14_s7, %s636_s8  ;;  %p642_p2 = scmp.lt.s32.totalorder %s636_s8, %s636_s8 }
   0x6   :  { %p643_p3 = por %p642_p2, %p641_p1 }
   0x8   :  { %p644_p4 = pnand %p643_p3, %p637_p0 }
   0xa   :  { %647 = shalt.err (!%p644_p4)
}
   0xb   :  { %s673_s9 = smov 128   ;;  %s674_s10 = smov 8  }
   0xc   :  { %19 = dma.hbm_to_vmem [thread:$0]  %s698_s0, 36864, %s14_s7, [#allocation3], %s673_s9, %s673_s9, %s674_s10  }
   0xd   :  { %668 = dma.done.wait [#allocation3], 36864  }
   0xe   :  { %669 = vsyncadd [#allocation3], 4294930432  ;;  %v23_v0 = vld [vmem:[#allocation2] sm:$0xff]  ;;  %v24_v6 = vld [vmem:[#allocation2 + $0x8] sm:$0xff]  ;;  %s675_s0 = smov [#allocation5]  }
   0xf   :  { %v56_v1 = vld [vmem:[#allocation2 + $0x100] sm:$0xff]  ;;  %v57_v7 = vld [vmem:[#allocation2 + $0x108] sm:$0xff]  ;;  %v25_v15 = vld [vmem:[#allocation2 + $0x10] sm:$0xff]  ;;  %s612_s13 = sshll.u32 %s675_s0, 4  ;;  %s613_s13 = int_to_ptr.vmem [resolvable:$true] %s612_s13 }
  0x10   :  { %v121_v2 = vld [vmem:[#allocation2 + $0x200] sm:$0xff]  ;;  %v88_v3 = vmax.f32 %v23_v0, %v56_v1  ;;  %v122_v8 = vld [vmem:[#allocation2 + $0x208] sm:$0xff]  ;;  %v89_v10 = vmax.f32 %v24_v6, %v57_v7  ;;  %v58_v16 = vld [vmem:[#allocation2 + $0x110] sm:$0xff]  ;;  %s648_s14 = scalar_lea.vmem %s613_s13, 4096  ;;  %p653_p6 = scmp.lt.s32.totalorder %s613_s13, %s613_s13 }
  0x11   :  { %v186_v4 = vld [vmem:[#allocation2 + $0x300] sm:$0xff]  ;;  %v187_v13 = vld [vmem:[#allocation2 + $0x308] sm:$0xff]  ;;  %v123_v17 = vld [vmem:[#allocation2 + $0x210] sm:$0xff]  ;;  %v90_v20 = vmax.f32 %v25_v15, %v58_v16  ;;  %p649_p5 = scmp.ne.s32.totalorder %s613_s13, %s648_s14  ;;  %p654_p7 = scmp.lt.s32.totalorder %s648_s14, %s648_s14 }
  0x12   :  { %v153_v5 = vmax.f32 %v88_v3, %v121_v2  ;;  %v251_v9 = vld [vmem:[#allocation2 + $0x400] sm:$0xff]  ;;  %v154_v14 = vmax.f32 %v89_v10, %v122_v8  ;;  %v252_v19 = vld [vmem:[#allocation2 + $0x408] sm:$0xff]  ;;  %v188_v24 = vld [vmem:[#allocation2 + $0x310] sm:$0xff] }
  0x13   :  { %v316_v12 = vld [vmem:[#allocation2 + $0x500] sm:$0xff]  ;;  %v317_v23 = vld [vmem:[#allocation2 + $0x508] sm:$0xff]  ;;  %v155_v26 = vmax.f32 %v90_v20, %v123_v17  ;;  %v26_v27 = vld [vmem:[#allocation2 + $0x18] sm:$0xff]  ;;  %p655_p8 = por %p654_p7, %p653_p6 }
  0x14   :  { %v218_v11 = vmax.f32 %v153_v5, %v186_v4  ;;  %v381_v21 = vld [vmem:[#allocation2 + $0x600] sm:$0xff]  ;;  %v219_v22 = vmax.f32 %v154_v14, %v187_v13  ;;  %v59_v28 = vld [vmem:[#allocation2 + $0x118] sm:$0xff]  ;;  %v253_v33 = vld [vmem:[#allocation2 + $0x410] sm:$0xff] }
  0x15   :  { %v124_v29 = vld [vmem:[#allocation2 + $0x218] sm:$0xff]  ;;  %v446_v30 = vld [vmem:[#allocation2 + $0x700] sm:$0xff]  ;;  %v91_v34 = vmax.f32 %v26_v27, %v59_v28  ;;  %v382_v36 = vld [vmem:[#allocation2 + $0x608] sm:$0xff]  ;;  %v220_v37 = vmax.f32 %v155_v26, %v188_v24  ;;  %p656_p9 = pnand %p655_p8, %p649_p5 }
  0x16   :  { %v283_v18 = vmax.f32 %v218_v11, %v251_v9  ;;  %v511_v31 = vld [vmem:[#allocation2 + $0x800] sm:$0xff]  ;;  %v284_v32 = vmax.f32 %v219_v22, %v252_v19  ;;  %v318_v38 = vld [vmem:[#allocation2 + $0x510] sm:$0xff]  ;;  %v189_v39 = vld [vmem:[#allocation2 + $0x318] sm:$0xff] }
  0x17   :  { %v156_v41 = vmax.f32 %v91_v34, %v124_v29  ;;  %v27_v42 = vld [vmem:[#allocation2 + $0x20] sm:$0xff]  ;;  %v447_v46 = vld [vmem:[#allocation2 + $0x708] sm:$0xff]  ;;  %v285_v48 = vmax.f32 %v220_v37, %v253_v33  ;;  %v254_v49 = vld [vmem:[#allocation2 + $0x418] sm:$0xff] }
  0x18   :  { %v348_v25 = vmax.f32 %v283_v18, %v316_v12  ;;  %v349_v40 = vmax.f32 %v284_v32, %v317_v23  ;;  %v60_v43 = vld [vmem:[#allocation2 + $0x120] sm:$0xff]  ;;  %v512_v47 = vld [vmem:[#allocation2 + $0x808] sm:$0xff]  ;;  %v383_v52 = vld [vmem:[#allocation2 + $0x610] sm:$0xff] }
  0x19   :  { %v125_v44 = vld [vmem:[#allocation2 + $0x220] sm:$0xff]  ;;  %v92_v50 = vmax.f32 %v27_v42, %v60_v43  ;;  %v221_v53 = vmax.f32 %v156_v41, %v189_v39  ;;  %v319_v54 = vld [vmem:[#allocation2 + $0x518] sm:$0xff]  ;;  %v350_v57 = vmax.f32 %v285_v48, %v318_v38  ;;  %v28_v59 = vld [vmem:[#allocation2 + $0x28] sm:$0xff] }
  0x1a   :  { %v413_v35 = vmax.f32 %v348_v25, %v381_v21  ;;  %v414_v51 = vmax.f32 %v349_v40, %v382_v36  ;;  %v190_v55 = vld [vmem:[#allocation2 + $0x320] sm:$0xff]  ;;  %v61_v60 = vld [vmem:[#allocation2 + $0x128] sm:$0xff]  ;;  %v448_v63 = vld [vmem:[#allocation2 + $0x710] sm:$0xff] }
  0x1b   :  { %v157_v58 = vmax.f32 %v92_v50, %v125_v44  ;;  %v126_v61 = vld [vmem:[#allocation2 + $0x228] sm:$0xff]  ;;  %v513_v0 = vld [vmem:[#allocation2 + $0x810] sm:$0xff]  ;;  %v286_v1 = vmax.f32 %v221_v53, %v254_v49  ;;  %v255_v2 = vld [vmem:[#allocation2 + $0x420] sm:$0xff]  ;;  %v93_v3 = vmax.f32 %v28_v59, %v61_v60  ;;  %v415_v4 = vmax.f32 %v350_v57, %v383_v52 }
  0x1c   :  { %v478_v45 = vmax.f32 %v413_v35, %v446_v30  ;;  %v479_v62 = vmax.f32 %v414_v51, %v447_v46  ;;  %v384_v5 = vld [vmem:[#allocation2 + $0x618] sm:$0xff]  ;;  %v320_v7 = vld [vmem:[#allocation2 + $0x520] sm:$0xff]  ;;  %v191_v8 = vld [vmem:[#allocation2 + $0x328] sm:$0xff] }
  0x1d   :  { %v222_v6 = vmax.f32 %v157_v58, %v190_v55  ;;  %v351_v10 = vmax.f32 %v286_v1, %v319_v54  ;;  %v158_v11 = vmax.f32 %v93_v3, %v126_v61  ;;  %v29_v12 = vld [vmem:[#allocation2 + $0x30] sm:$0xff]  ;;  %v480_v15 = vmax.f32 %v415_v4, %v448_v63  ;;  %v449_v16 = vld [vmem:[#allocation2 + $0x718] sm:$0xff]  ;;  %v256_v19 = vld [vmem:[#allocation2 + $0x428] sm:$0xff] }
  0x1e   :  { %v543_v56 = vmax.f32 %v478_v45, %v511_v31  ;;  %v544_v9 = vmax.f32 %v479_v62, %v512_v47  ;;  %v62_v13 = vld [vmem:[#allocation2 + $0x130] sm:$0xff]  ;;  %v514_v17 = vld [vmem:[#allocation2 + $0x818] sm:$0xff]  ;;  %v385_v22 = vld [vmem:[#allocation2 + $0x620] sm:$0xff] }
  0x1f   :  { %v127_v14 = vld [vmem:[#allocation2 + $0x230] sm:$0xff]  ;;  %v287_v18 = vmax.f32 %v222_v6, %v255_v2  ;;  %v94_v20 = vmax.f32 %v29_v12, %v62_v13  ;;  %v416_v21 = vmax.f32 %v351_v10, %v384_v5  ;;  %v223_v23 = vmax.f32 %v158_v11, %v191_v8  ;;  %v321_v24 = vld [vmem:[#allocation2 + $0x528] sm:$0xff]  ;;  %v30_v29 = vld [vmem:[#allocation2 + $0x38] sm:$0xff] }
  0x20   :  { %575 = vst [vmem:[#allocation5] sm:$0xff] %v543_v56  ;;  %576 = vst [vmem:[#allocation5 + $0x8] sm:$0xff] %v544_v9  ;;  %v192_v25 = vld [vmem:[#allocation2 + $0x330] sm:$0xff]  ;;  %v545_v26 = vmax.f32 %v480_v15, %v513_v0  ;;  %v63_v30 = vld [vmem:[#allocation2 + $0x138] sm:$0xff] }
  0x21   :  { %v352_v27 = vmax.f32 %v287_v18, %v320_v7  ;;  %v159_v28 = vmax.f32 %v94_v20, %v127_v14  ;;  %v128_v31 = vld [vmem:[#allocation2 + $0x238] sm:$0xff]  ;;  %v481_v32 = vmax.f32 %v416_v21, %v449_v16  ;;  %v450_v33 = vld [vmem:[#allocation2 + $0x720] sm:$0xff]  ;;  %v288_v35 = vmax.f32 %v223_v23, %v256_v19  ;;  %v257_v36 = vld [vmem:[#allocation2 + $0x430] sm:$0xff] }
  0x22   :  { %v515_v34 = vld [vmem:[#allocation2 + $0x820] sm:$0xff]  ;;  %v95_v37 = vmax.f32 %v30_v29, %v63_v30  ;;  %577 = vst [vmem:[#allocation5 + $0x10] sm:$0xff] %v545_v26  ;;  %v386_v39 = vld [vmem:[#allocation2 + $0x628] sm:$0xff]  ;;  %v322_v41 = vld [vmem:[#allocation2 + $0x530] sm:$0xff] }
  0x23   :  { %v417_v38 = vmax.f32 %v352_v27, %v385_v22  ;;  %v224_v40 = vmax.f32 %v159_v28, %v192_v25  ;;  %v193_v42 = vld [vmem:[#allocation2 + $0x338] sm:$0xff]  ;;  %v546_v43 = vmax.f32 %v481_v32, %v514_v17  ;;  %v353_v44 = vmax.f32 %v288_v35, %v321_v24  ;;  %v31_v46 = vld [vmem:[#allocation2 + $0x40] sm:$0xff]  ;;  %v451_v50 = vld [vmem:[#allocation2 + $0x728] sm:$0xff] }
  0x24   :  { %v160_v45 = vmax.f32 %v95_v37, %v128_v31  ;;  %v64_v47 = vld [vmem:[#allocation2 + $0x140] sm:$0xff]  ;;  %v516_v51 = vld [vmem:[#allocation2 + $0x828] sm:$0xff]  ;;  %v258_v53 = vld [vmem:[#allocation2 + $0x438] sm:$0xff] }
  0x25   :  { %v129_v48 = vld [vmem:[#allocation2 + $0x240] sm:$0xff]  ;;  %v482_v49 = vmax.f32 %v417_v38, %v450_v33  ;;  %v289_v52 = vmax.f32 %v224_v40, %v257_v36  ;;  %v96_v54 = vmax.f32 %v31_v46, %v64_v47  ;;  %578 = vst [vmem:[#allocation5 + $0x18] sm:$0xff] %v546_v43  ;;  %v418_v55 = vmax.f32 %v353_v44, %v386_v39  ;;  %v387_v56 = vld [vmem:[#allocation2 + $0x630] sm:$0xff]  ;;  %v323_v58 = vld [vmem:[#allocation2 + $0x538] sm:$0xff] }
  0x26   :  { %v225_v57 = vmax.f32 %v160_v45, %v193_v42  ;;  %v194_v59 = vld [vmem:[#allocation2 + $0x340] sm:$0xff]  ;;  %v32_v63 = vld [vmem:[#allocation2 + $0x48] sm:$0xff]  ;;  %v452_v3 = vld [vmem:[#allocation2 + $0x730] sm:$0xff] }
  0x27   :  { %v547_v60 = vmax.f32 %v482_v49, %v515_v34  ;;  %v354_v61 = vmax.f32 %v289_v52, %v322_v41  ;;  %v161_v62 = vmax.f32 %v96_v54, %v129_v48  ;;  %v65_v0 = vld [vmem:[#allocation2 + $0x148] sm:$0xff]  ;;  %v483_v2 = vmax.f32 %v418_v55, %v451_v50  ;;  %v517_v4 = vld [vmem:[#allocation2 + $0x830] sm:$0xff]  ;;  %v259_v6 = vld [vmem:[#allocation2 + $0x440] sm:$0xff] }
  0x28   :  { %v130_v1 = vld [vmem:[#allocation2 + $0x248] sm:$0xff]  ;;  %v290_v5 = vmax.f32 %v225_v57, %v258_v53  ;;  %v97_v7 = vmax.f32 %v32_v63, %v65_v0  ;;  %v388_v9 = vld [vmem:[#allocation2 + $0x638] sm:$0xff]  ;;  %v324_v11 = vld [vmem:[#allocation2 + $0x540] sm:$0xff] }
  0x29   :  { %579 = vst [vmem:[#allocation5 + $0x20] sm:$0xff] %v547_v60  ;;  %v419_v8 = vmax.f32 %v354_v61, %v387_v56  ;;  %v226_v10 = vmax.f32 %v161_v62, %v194_v59  ;;  %v195_v12 = vld [vmem:[#allocation2 + $0x348] sm:$0xff]  ;;  %v548_v13 = vmax.f32 %v483_v2, %v516_v51  ;;  %v33_v16 = vld [vmem:[#allocation2 + $0x50] sm:$0xff]  ;;  %v453_v20 = vld [vmem:[#allocation2 + $0x738] sm:$0xff] }
  0x2a   :  { %v355_v14 = vmax.f32 %v290_v5, %v323_v58  ;;  %v162_v15 = vmax.f32 %v97_v7, %v130_v1  ;;  %v66_v17 = vld [vmem:[#allocation2 + $0x150] sm:$0xff]  ;;  %v518_v21 = vld [vmem:[#allocation2 + $0x838] sm:$0xff]  ;;  %v260_v23 = vld [vmem:[#allocation2 + $0x448] sm:$0xff] }
  0x2b   :  { %v131_v18 = vld [vmem:[#allocation2 + $0x250] sm:$0xff]  ;;  %v484_v19 = vmax.f32 %v419_v8, %v452_v3  ;;  %v291_v22 = vmax.f32 %v226_v10, %v259_v6  ;;  %v98_v24 = vmax.f32 %v33_v16, %v66_v17  ;;  %580 = vst [vmem:[#allocation5 + $0x28] sm:$0xff] %v548_v13  ;;  %v389_v26 = vld [vmem:[#allocation2 + $0x640] sm:$0xff]  ;;  %v325_v28 = vld [vmem:[#allocation2 + $0x548] sm:$0xff] }
  0x2c   :  { %v420_v25 = vmax.f32 %v355_v14, %v388_v9  ;;  %v227_v27 = vmax.f32 %v162_v15, %v195_v12  ;;  %v196_v29 = vld [vmem:[#allocation2 + $0x350] sm:$0xff]  ;;  %v34_v33 = vld [vmem:[#allocation2 + $0x58] sm:$0xff]  ;;  %v454_v37 = vld [vmem:[#allocation2 + $0x740] sm:$0xff] }
  0x2d   :  { %v549_v30 = vmax.f32 %v484_v19, %v517_v4  ;;  %v356_v31 = vmax.f32 %v291_v22, %v324_v11  ;;  %v163_v32 = vmax.f32 %v98_v24, %v131_v18  ;;  %v67_v34 = vld [vmem:[#allocation2 + $0x158] sm:$0xff]  ;;  %v519_v38 = vld [vmem:[#allocation2 + $0x840] sm:$0xff]  ;;  %v261_v40 = vld [vmem:[#allocation2 + $0x450] sm:$0xff] }
  0x2e   :  { %v132_v35 = vld [vmem:[#allocation2 + $0x258] sm:$0xff]  ;;  %v485_v36 = vmax.f32 %v420_v25, %v453_v20  ;;  %v292_v39 = vmax.f32 %v227_v27, %v260_v23  ;;  %v99_v41 = vmax.f32 %v34_v33, %v67_v34  ;;  %v390_v43 = vld [vmem:[#allocation2 + $0x648] sm:$0xff]  ;;  %v326_v45 = vld [vmem:[#allocation2 + $0x550] sm:$0xff] }
  0x2f   :  { %581 = vst [vmem:[#allocation5 + $0x30] sm:$0xff] %v549_v30  ;;  %v421_v42 = vmax.f32 %v356_v31, %v389_v26  ;;  %v228_v44 = vmax.f32 %v163_v32, %v196_v29  ;;  %v197_v46 = vld [vmem:[#allocation2 + $0x358] sm:$0xff]  ;;  %v35_v50 = vld [vmem:[#allocation2 + $0x60] sm:$0xff]  ;;  %v455_v54 = vld [vmem:[#allocation2 + $0x748] sm:$0xff] }
  0x30   :  { %v550_v47 = vmax.f32 %v485_v36, %v518_v21  ;;  %v357_v48 = vmax.f32 %v292_v39, %v325_v28  ;;  %v164_v49 = vmax.f32 %v99_v41, %v132_v35  ;;  %v68_v51 = vld [vmem:[#allocation2 + $0x160] sm:$0xff]  ;;  %v520_v55 = vld [vmem:[#allocation2 + $0x848] sm:$0xff]  ;;  %v262_v57 = vld [vmem:[#allocation2 + $0x458] sm:$0xff] }
  0x31   :  { %v133_v52 = vld [vmem:[#allocation2 + $0x260] sm:$0xff]  ;;  %v486_v53 = vmax.f32 %v421_v42, %v454_v37  ;;  %v293_v56 = vmax.f32 %v228_v44, %v261_v40  ;;  %v100_v58 = vmax.f32 %v35_v50, %v68_v51  ;;  %v391_v60 = vld [vmem:[#allocation2 + $0x650] sm:$0xff]  ;;  %v327_v62 = vld [vmem:[#allocation2 + $0x558] sm:$0xff] }
  0x32   :  { %582 = vst [vmem:[#allocation5 + $0x38] sm:$0xff] %v550_v47  ;;  %v422_v59 = vmax.f32 %v357_v48, %v390_v43  ;;  %v229_v61 = vmax.f32 %v164_v49, %v197_v46  ;;  %v198_v63 = vld [vmem:[#allocation2 + $0x360] sm:$0xff]  ;;  %v36_v3 = vld [vmem:[#allocation2 + $0x68] sm:$0xff]  ;;  %v456_v7 = vld [vmem:[#allocation2 + $0x750] sm:$0xff] }
  0x33   :  { %v551_v0 = vmax.f32 %v486_v53, %v519_v38  ;;  %v358_v1 = vmax.f32 %v293_v56, %v326_v45  ;;  %v165_v2 = vmax.f32 %v100_v58, %v133_v52  ;;  %v69_v4 = vld [vmem:[#allocation2 + $0x168] sm:$0xff]  ;;  %v521_v8 = vld [vmem:[#allocation2 + $0x850] sm:$0xff]  ;;  %v263_v10 = vld [vmem:[#allocation2 + $0x460] sm:$0xff] }
  0x34   :  { %v134_v5 = vld [vmem:[#allocation2 + $0x268] sm:$0xff]  ;;  %v487_v6 = vmax.f32 %v422_v59, %v455_v54  ;;  %v294_v9 = vmax.f32 %v229_v61, %v262_v57  ;;  %v101_v11 = vmax.f32 %v36_v3, %v69_v4  ;;  %v392_v13 = vld [vmem:[#allocation2 + $0x658] sm:$0xff]  ;;  %v328_v15 = vld [vmem:[#allocation2 + $0x560] sm:$0xff] }
  0x35   :  { %583 = vst [vmem:[#allocation5 + $0x40] sm:$0xff] %v551_v0  ;;  %v423_v12 = vmax.f32 %v358_v1, %v391_v60  ;;  %v230_v14 = vmax.f32 %v165_v2, %v198_v63  ;;  %v199_v16 = vld [vmem:[#allocation2 + $0x368] sm:$0xff]  ;;  %v37_v20 = vld [vmem:[#allocation2 + $0x70] sm:$0xff]  ;;  %v457_v24 = vld [vmem:[#allocation2 + $0x758] sm:$0xff] }
  0x36   :  { %v552_v17 = vmax.f32 %v487_v6, %v520_v55  ;;  %v359_v18 = vmax.f32 %v294_v9, %v327_v62  ;;  %v166_v19 = vmax.f32 %v101_v11, %v134_v5  ;;  %v70_v21 = vld [vmem:[#allocation2 + $0x170] sm:$0xff]  ;;  %v522_v25 = vld [vmem:[#allocation2 + $0x858] sm:$0xff]  ;;  %v264_v27 = vld [vmem:[#allocation2 + $0x468] sm:$0xff] }
  0x37   :  { %v135_v22 = vld [vmem:[#allocation2 + $0x270] sm:$0xff]  ;;  %v488_v23 = vmax.f32 %v423_v12, %v456_v7  ;;  %v295_v26 = vmax.f32 %v230_v14, %v263_v10  ;;  %v102_v28 = vmax.f32 %v37_v20, %v70_v21  ;;  %v393_v30 = vld [vmem:[#allocation2 + $0x660] sm:$0xff]  ;;  %v329_v32 = vld [vmem:[#allocation2 + $0x568] sm:$0xff] }
  0x38   :  { %584 = vst [vmem:[#allocation5 + $0x48] sm:$0xff] %v552_v17  ;;  %v424_v29 = vmax.f32 %v359_v18, %v392_v13  ;;  %v231_v31 = vmax.f32 %v166_v19, %v199_v16  ;;  %v200_v33 = vld [vmem:[#allocation2 + $0x370] sm:$0xff]  ;;  %v38_v37 = vld [vmem:[#allocation2 + $0x78] sm:$0xff]  ;;  %v458_v41 = vld [vmem:[#allocation2 + $0x760] sm:$0xff] }
  0x39   :  { %v553_v34 = vmax.f32 %v488_v23, %v521_v8  ;;  %v360_v35 = vmax.f32 %v295_v26, %v328_v15  ;;  %v167_v36 = vmax.f32 %v102_v28, %v135_v22  ;;  %v71_v38 = vld [vmem:[#allocation2 + $0x178] sm:$0xff]  ;;  %v523_v42 = vld [vmem:[#allocation2 + $0x860] sm:$0xff]  ;;  %v265_v44 = vld [vmem:[#allocation2 + $0x470] sm:$0xff] }
  0x3a   :  { %v136_v39 = vld [vmem:[#allocation2 + $0x278] sm:$0xff]  ;;  %v489_v40 = vmax.f32 %v424_v29, %v457_v24  ;;  %v296_v43 = vmax.f32 %v231_v31, %v264_v27  ;;  %v103_v45 = vmax.f32 %v38_v37, %v71_v38  ;;  %v394_v47 = vld [vmem:[#allocation2 + $0x668] sm:$0xff]  ;;  %v330_v49 = vld [vmem:[#allocation2 + $0x570] sm:$0xff] }
  0x3b   :  { %585 = vst [vmem:[#allocation5 + $0x50] sm:$0xff] %v553_v34  ;;  %v425_v46 = vmax.f32 %v360_v35, %v393_v30  ;;  %v232_v48 = vmax.f32 %v167_v36, %v200_v33  ;;  %v201_v50 = vld [vmem:[#allocation2 + $0x378] sm:$0xff]  ;;  %v39_v54 = vld [vmem:[#allocation2 + $0x80] sm:$0xff]  ;;  %v459_v58 = vld [vmem:[#allocation2 + $0x768] sm:$0xff] }
  0x3c   :  { %v554_v51 = vmax.f32 %v489_v40, %v522_v25  ;;  %v361_v52 = vmax.f32 %v296_v43, %v329_v32  ;;  %v168_v53 = vmax.f32 %v103_v45, %v136_v39  ;;  %v72_v55 = vld [vmem:[#allocation2 + $0x180] sm:$0xff]  ;;  %v524_v59 = vld [vmem:[#allocation2 + $0x868] sm:$0xff]  ;;  %v266_v61 = vld [vmem:[#allocation2 + $0x478] sm:$0xff] }
  0x3d   :  { %v137_v56 = vld [vmem:[#allocation2 + $0x280] sm:$0xff]  ;;  %v490_v57 = vmax.f32 %v425_v46, %v458_v41  ;;  %v297_v60 = vmax.f32 %v232_v48, %v265_v44  ;;  %v104_v62 = vmax.f32 %v39_v54, %v72_v55  ;;  %v395_v0 = vld [vmem:[#allocation2 + $0x670] sm:$0xff]  ;;  %v331_v2 = vld [vmem:[#allocation2 + $0x578] sm:$0xff] }
  0x3e   :  { %586 = vst [vmem:[#allocation5 + $0x58] sm:$0xff] %v554_v51  ;;  %v426_v63 = vmax.f32 %v361_v52, %v394_v47  ;;  %v233_v1 = vmax.f32 %v168_v53, %v201_v50  ;;  %v202_v3 = vld [vmem:[#allocation2 + $0x380] sm:$0xff]  ;;  %v40_v7 = vld [vmem:[#allocation2 + $0x88] sm:$0xff]  ;;  %v460_v11 = vld [vmem:[#allocation2 + $0x770] sm:$0xff] }
  0x3f   :  { %v555_v4 = vmax.f32 %v490_v57, %v523_v42  ;;  %v362_v5 = vmax.f32 %v297_v60, %v330_v49  ;;  %v169_v6 = vmax.f32 %v104_v62, %v137_v56  ;;  %v73_v8 = vld [vmem:[#allocation2 + $0x188] sm:$0xff]  ;;  %v525_v12 = vld [vmem:[#allocation2 + $0x870] sm:$0xff]  ;;  %v267_v14 = vld [vmem:[#allocation2 + $0x480] sm:$0xff] }
  0x40   :  { %v138_v9 = vld [vmem:[#allocation2 + $0x288] sm:$0xff]  ;;  %v491_v10 = vmax.f32 %v426_v63, %v459_v58  ;;  %v298_v13 = vmax.f32 %v233_v1, %v266_v61  ;;  %v105_v15 = vmax.f32 %v40_v7, %v73_v8  ;;  %v396_v17 = vld [vmem:[#allocation2 + $0x678] sm:$0xff]  ;;  %v332_v19 = vld [vmem:[#allocation2 + $0x580] sm:$0xff] }
  0x41   :  { %587 = vst [vmem:[#allocation5 + $0x60] sm:$0xff] %v555_v4  ;;  %v427_v16 = vmax.f32 %v362_v5, %v395_v0  ;;  %v234_v18 = vmax.f32 %v169_v6, %v202_v3  ;;  %v203_v20 = vld [vmem:[#allocation2 + $0x388] sm:$0xff]  ;;  %v41_v24 = vld [vmem:[#allocation2 + $0x90] sm:$0xff]  ;;  %v461_v28 = vld [vmem:[#allocation2 + $0x778] sm:$0xff] }
  0x42   :  { %v556_v21 = vmax.f32 %v491_v10, %v524_v59  ;;  %v363_v22 = vmax.f32 %v298_v13, %v331_v2  ;;  %v170_v23 = vmax.f32 %v105_v15, %v138_v9  ;;  %v74_v25 = vld [vmem:[#allocation2 + $0x190] sm:$0xff]  ;;  %v526_v29 = vld [vmem:[#allocation2 + $0x878] sm:$0xff]  ;;  %v268_v31 = vld [vmem:[#allocation2 + $0x488] sm:$0xff] }
  0x43   :  { %v139_v26 = vld [vmem:[#allocation2 + $0x290] sm:$0xff]  ;;  %v492_v27 = vmax.f32 %v427_v16, %v460_v11  ;;  %v299_v30 = vmax.f32 %v234_v18, %v267_v14  ;;  %v106_v32 = vmax.f32 %v41_v24, %v74_v25  ;;  %v397_v34 = vld [vmem:[#allocation2 + $0x680] sm:$0xff]  ;;  %v333_v36 = vld [vmem:[#allocation2 + $0x588] sm:$0xff] }
  0x44   :  { %588 = vst [vmem:[#allocation5 + $0x68] sm:$0xff] %v556_v21  ;;  %v428_v33 = vmax.f32 %v363_v22, %v396_v17  ;;  %v235_v35 = vmax.f32 %v170_v23, %v203_v20  ;;  %v204_v37 = vld [vmem:[#allocation2 + $0x390] sm:$0xff]  ;;  %v42_v41 = vld [vmem:[#allocation2 + $0x98] sm:$0xff]  ;;  %v462_v45 = vld [vmem:[#allocation2 + $0x780] sm:$0xff] }
  0x45   :  { %v557_v38 = vmax.f32 %v492_v27, %v525_v12  ;;  %v364_v39 = vmax.f32 %v299_v30, %v332_v19  ;;  %v171_v40 = vmax.f32 %v106_v32, %v139_v26  ;;  %v75_v42 = vld [vmem:[#allocation2 + $0x198] sm:$0xff]  ;;  %v527_v46 = vld [vmem:[#allocation2 + $0x880] sm:$0xff]  ;;  %v269_v48 = vld [vmem:[#allocation2 + $0x490] sm:$0xff] }
  0x46   :  { %v140_v43 = vld [vmem:[#allocation2 + $0x298] sm:$0xff]  ;;  %v493_v44 = vmax.f32 %v428_v33, %v461_v28  ;;  %v300_v47 = vmax.f32 %v235_v35, %v268_v31  ;;  %v107_v49 = vmax.f32 %v42_v41, %v75_v42  ;;  %v398_v51 = vld [vmem:[#allocation2 + $0x688] sm:$0xff]  ;;  %v334_v53 = vld [vmem:[#allocation2 + $0x590] sm:$0xff] }
  0x47   :  { %589 = vst [vmem:[#allocation5 + $0x70] sm:$0xff] %v557_v38  ;;  %v429_v50 = vmax.f32 %v364_v39, %v397_v34  ;;  %v236_v52 = vmax.f32 %v171_v40, %v204_v37  ;;  %v205_v54 = vld [vmem:[#allocation2 + $0x398] sm:$0xff]  ;;  %v43_v58 = vld [vmem:[#allocation2 + $0xa0] sm:$0xff]  ;;  %v463_v62 = vld [vmem:[#allocation2 + $0x788] sm:$0xff] }
  0x48   :  { %v558_v55 = vmax.f32 %v493_v44, %v526_v29  ;;  %v365_v56 = vmax.f32 %v300_v47, %v333_v36  ;;  %v172_v57 = vmax.f32 %v107_v49, %v140_v43  ;;  %v76_v59 = vld [vmem:[#allocation2 + $0x1a0] sm:$0xff]  ;;  %v528_v63 = vld [vmem:[#allocation2 + $0x888] sm:$0xff]  ;;  %v270_v1 = vld [vmem:[#allocation2 + $0x498] sm:$0xff] }
  0x49   :  { %v141_v60 = vld [vmem:[#allocation2 + $0x2a0] sm:$0xff]  ;;  %v494_v61 = vmax.f32 %v429_v50, %v462_v45  ;;  %v301_v0 = vmax.f32 %v236_v52, %v269_v48  ;;  %v108_v2 = vmax.f32 %v43_v58, %v76_v59  ;;  %v399_v4 = vld [vmem:[#allocation2 + $0x690] sm:$0xff]  ;;  %v335_v6 = vld [vmem:[#allocation2 + $0x598] sm:$0xff] }
  0x4a   :  { %590 = vst [vmem:[#allocation5 + $0x78] sm:$0xff] %v558_v55  ;;  %v430_v3 = vmax.f32 %v365_v56, %v398_v51  ;;  %v237_v5 = vmax.f32 %v172_v57, %v205_v54  ;;  %v206_v7 = vld [vmem:[#allocation2 + $0x3a0] sm:$0xff]  ;;  %v44_v11 = vld [vmem:[#allocation2 + $0xa8] sm:$0xff]  ;;  %v464_v15 = vld [vmem:[#allocation2 + $0x790] sm:$0xff] }
  0x4b   :  { %v559_v8 = vmax.f32 %v494_v61, %v527_v46  ;;  %v366_v9 = vmax.f32 %v301_v0, %v334_v53  ;;  %v173_v10 = vmax.f32 %v108_v2, %v141_v60  ;;  %v77_v12 = vld [vmem:[#allocation2 + $0x1a8] sm:$0xff]  ;;  %v529_v16 = vld [vmem:[#allocation2 + $0x890] sm:$0xff]  ;;  %v271_v18 = vld [vmem:[#allocation2 + $0x4a0] sm:$0xff] }
  0x4c   :  { %v142_v13 = vld [vmem:[#allocation2 + $0x2a8] sm:$0xff]  ;;  %v495_v14 = vmax.f32 %v430_v3, %v463_v62  ;;  %v302_v17 = vmax.f32 %v237_v5, %v270_v1  ;;  %v109_v19 = vmax.f32 %v44_v11, %v77_v12  ;;  %v400_v21 = vld [vmem:[#allocation2 + $0x698] sm:$0xff]  ;;  %v336_v23 = vld [vmem:[#allocation2 + $0x5a0] sm:$0xff] }
  0x4d   :  { %591 = vst [vmem:[#allocation5 + $0x80] sm:$0xff] %v559_v8  ;;  %v431_v20 = vmax.f32 %v366_v9, %v399_v4  ;;  %v238_v22 = vmax.f32 %v173_v10, %v206_v7  ;;  %v207_v24 = vld [vmem:[#allocation2 + $0x3a8] sm:$0xff]  ;;  %v45_v28 = vld [vmem:[#allocation2 + $0xb0] sm:$0xff]  ;;  %v465_v32 = vld [vmem:[#allocation2 + $0x798] sm:$0xff] }
  0x4e   :  { %v560_v25 = vmax.f32 %v495_v14, %v528_v63  ;;  %v367_v26 = vmax.f32 %v302_v17, %v335_v6  ;;  %v174_v27 = vmax.f32 %v109_v19, %v142_v13  ;;  %v78_v29 = vld [vmem:[#allocation2 + $0x1b0] sm:$0xff]  ;;  %v530_v33 = vld [vmem:[#allocation2 + $0x898] sm:$0xff]  ;;  %v272_v35 = vld [vmem:[#allocation2 + $0x4a8] sm:$0xff] }
  0x4f   :  { %v143_v30 = vld [vmem:[#allocation2 + $0x2b0] sm:$0xff]  ;;  %v496_v31 = vmax.f32 %v431_v20, %v464_v15  ;;  %v303_v34 = vmax.f32 %v238_v22, %v271_v18  ;;  %v110_v36 = vmax.f32 %v45_v28, %v78_v29  ;;  %v401_v38 = vld [vmem:[#allocation2 + $0x6a0] sm:$0xff]  ;;  %v337_v40 = vld [vmem:[#allocation2 + $0x5a8] sm:$0xff] }
  0x50   :  { %592 = vst [vmem:[#allocation5 + $0x88] sm:$0xff] %v560_v25  ;;  %v432_v37 = vmax.f32 %v367_v26, %v400_v21  ;;  %v239_v39 = vmax.f32 %v174_v27, %v207_v24  ;;  %v208_v41 = vld [vmem:[#allocation2 + $0x3b0] sm:$0xff]  ;;  %v46_v45 = vld [vmem:[#allocation2 + $0xb8] sm:$0xff]  ;;  %v466_v49 = vld [vmem:[#allocation2 + $0x7a0] sm:$0xff] }
  0x51   :  { %v561_v42 = vmax.f32 %v496_v31, %v529_v16  ;;  %v368_v43 = vmax.f32 %v303_v34, %v336_v23  ;;  %v175_v44 = vmax.f32 %v110_v36, %v143_v30  ;;  %v79_v46 = vld [vmem:[#allocation2 + $0x1b8] sm:$0xff]  ;;  %v531_v50 = vld [vmem:[#allocation2 + $0x8a0] sm:$0xff]  ;;  %v273_v52 = vld [vmem:[#allocation2 + $0x4b0] sm:$0xff] }
  0x52   :  { %v144_v47 = vld [vmem:[#allocation2 + $0x2b8] sm:$0xff]  ;;  %v497_v48 = vmax.f32 %v432_v37, %v465_v32  ;;  %v304_v51 = vmax.f32 %v239_v39, %v272_v35  ;;  %v111_v53 = vmax.f32 %v46_v45, %v79_v46  ;;  %v402_v55 = vld [vmem:[#allocation2 + $0x6a8] sm:$0xff]  ;;  %v338_v57 = vld [vmem:[#allocation2 + $0x5b0] sm:$0xff] }
  0x53   :  { %593 = vst [vmem:[#allocation5 + $0x90] sm:$0xff] %v561_v42  ;;  %v433_v54 = vmax.f32 %v368_v43, %v401_v38  ;;  %v240_v56 = vmax.f32 %v175_v44, %v208_v41  ;;  %v209_v58 = vld [vmem:[#allocation2 + $0x3b8] sm:$0xff]  ;;  %v47_v62 = vld [vmem:[#allocation2 + $0xc0] sm:$0xff]  ;;  %v467_v2 = vld [vmem:[#allocation2 + $0x7a8] sm:$0xff] }
  0x54   :  { %v562_v59 = vmax.f32 %v497_v48, %v530_v33  ;;  %v369_v60 = vmax.f32 %v304_v51, %v337_v40  ;;  %v176_v61 = vmax.f32 %v111_v53, %v144_v47  ;;  %v80_v63 = vld [vmem:[#allocation2 + $0x1c0] sm:$0xff]  ;;  %v532_v3 = vld [vmem:[#allocation2 + $0x8a8] sm:$0xff]  ;;  %v274_v5 = vld [vmem:[#allocation2 + $0x4b8] sm:$0xff] }
  0x55   :  { %v145_v0 = vld [vmem:[#allocation2 + $0x2c0] sm:$0xff]  ;;  %v498_v1 = vmax.f32 %v433_v54, %v466_v49  ;;  %v305_v4 = vmax.f32 %v240_v56, %v273_v52  ;;  %v112_v6 = vmax.f32 %v47_v62, %v80_v63  ;;  %v403_v8 = vld [vmem:[#allocation2 + $0x6b0] sm:$0xff]  ;;  %v339_v10 = vld [vmem:[#allocation2 + $0x5b8] sm:$0xff] }
  0x56   :  { %594 = vst [vmem:[#allocation5 + $0x98] sm:$0xff] %v562_v59  ;;  %v434_v7 = vmax.f32 %v369_v60, %v402_v55  ;;  %v241_v9 = vmax.f32 %v176_v61, %v209_v58  ;;  %v210_v11 = vld [vmem:[#allocation2 + $0x3c0] sm:$0xff]  ;;  %v48_v15 = vld [vmem:[#allocation2 + $0xc8] sm:$0xff]  ;;  %v468_v19 = vld [vmem:[#allocation2 + $0x7b0] sm:$0xff] }
  0x57   :  { %v563_v12 = vmax.f32 %v498_v1, %v531_v50  ;;  %v370_v13 = vmax.f32 %v305_v4, %v338_v57  ;;  %v177_v14 = vmax.f32 %v112_v6, %v145_v0  ;;  %v81_v16 = vld [vmem:[#allocation2 + $0x1c8] sm:$0xff]  ;;  %v533_v20 = vld [vmem:[#allocation2 + $0x8b0] sm:$0xff]  ;;  %v275_v22 = vld [vmem:[#allocation2 + $0x4c0] sm:$0xff] }
  0x58   :  { %v146_v17 = vld [vmem:[#allocation2 + $0x2c8] sm:$0xff]  ;;  %v499_v18 = vmax.f32 %v434_v7, %v467_v2  ;;  %v306_v21 = vmax.f32 %v241_v9, %v274_v5  ;;  %v113_v23 = vmax.f32 %v48_v15, %v81_v16  ;;  %v404_v25 = vld [vmem:[#allocation2 + $0x6b8] sm:$0xff]  ;;  %v340_v27 = vld [vmem:[#allocation2 + $0x5c0] sm:$0xff] }
  0x59   :  { %595 = vst [vmem:[#allocation5 + $0xa0] sm:$0xff] %v563_v12  ;;  %v435_v24 = vmax.f32 %v370_v13, %v403_v8  ;;  %v242_v26 = vmax.f32 %v177_v14, %v210_v11  ;;  %v211_v28 = vld [vmem:[#allocation2 + $0x3c8] sm:$0xff]  ;;  %v49_v32 = vld [vmem:[#allocation2 + $0xd0] sm:$0xff]  ;;  %v469_v36 = vld [vmem:[#allocation2 + $0x7b8] sm:$0xff] }
  0x5a   :  { %v564_v29 = vmax.f32 %v499_v18, %v532_v3  ;;  %v371_v30 = vmax.f32 %v306_v21, %v339_v10  ;;  %v178_v31 = vmax.f32 %v113_v23, %v146_v17  ;;  %v82_v33 = vld [vmem:[#allocation2 + $0x1d0] sm:$0xff]  ;;  %v534_v37 = vld [vmem:[#allocation2 + $0x8b8] sm:$0xff]  ;;  %v276_v39 = vld [vmem:[#allocation2 + $0x4c8] sm:$0xff] }
  0x5b   :  { %v147_v34 = vld [vmem:[#allocation2 + $0x2d0] sm:$0xff]  ;;  %v500_v35 = vmax.f32 %v435_v24, %v468_v19  ;;  %v307_v38 = vmax.f32 %v242_v26, %v275_v22  ;;  %v114_v40 = vmax.f32 %v49_v32, %v82_v33  ;;  %v405_v42 = vld [vmem:[#allocation2 + $0x6c0] sm:$0xff]  ;;  %v341_v44 = vld [vmem:[#allocation2 + $0x5c8] sm:$0xff] }
  0x5c   :  { %596 = vst [vmem:[#allocation5 + $0xa8] sm:$0xff] %v564_v29  ;;  %v436_v41 = vmax.f32 %v371_v30, %v404_v25  ;;  %v243_v43 = vmax.f32 %v178_v31, %v211_v28  ;;  %v212_v45 = vld [vmem:[#allocation2 + $0x3d0] sm:$0xff]  ;;  %v50_v49 = vld [vmem:[#allocation2 + $0xd8] sm:$0xff]  ;;  %v470_v53 = vld [vmem:[#allocation2 + $0x7c0] sm:$0xff] }
  0x5d   :  { %v565_v46 = vmax.f32 %v500_v35, %v533_v20  ;;  %v372_v47 = vmax.f32 %v307_v38, %v340_v27  ;;  %v179_v48 = vmax.f32 %v114_v40, %v147_v34  ;;  %v83_v50 = vld [vmem:[#allocation2 + $0x1d8] sm:$0xff]  ;;  %v535_v54 = vld [vmem:[#allocation2 + $0x8c0] sm:$0xff]  ;;  %v277_v56 = vld [vmem:[#allocation2 + $0x4d0] sm:$0xff] }
  0x5e   :  { %v148_v51 = vld [vmem:[#allocation2 + $0x2d8] sm:$0xff]  ;;  %v501_v52 = vmax.f32 %v436_v41, %v469_v36  ;;  %v308_v55 = vmax.f32 %v243_v43, %v276_v39  ;;  %v115_v57 = vmax.f32 %v50_v49, %v83_v50  ;;  %v406_v59 = vld [vmem:[#allocation2 + $0x6c8] sm:$0xff]  ;;  %v342_v61 = vld [vmem:[#allocation2 + $0x5d0] sm:$0xff] }
  0x5f   :  { %597 = vst [vmem:[#allocation5 + $0xb0] sm:$0xff] %v565_v46  ;;  %v437_v58 = vmax.f32 %v372_v47, %v405_v42  ;;  %v244_v60 = vmax.f32 %v179_v48, %v212_v45  ;;  %v213_v62 = vld [vmem:[#allocation2 + $0x3d8] sm:$0xff]  ;;  %v51_v2 = vld [vmem:[#allocation2 + $0xe0] sm:$0xff]  ;;  %v471_v6 = vld [vmem:[#allocation2 + $0x7c8] sm:$0xff] }
  0x60   :  { %v566_v63 = vmax.f32 %v501_v52, %v534_v37  ;;  %v373_v0 = vmax.f32 %v308_v55, %v341_v44  ;;  %v180_v1 = vmax.f32 %v115_v57, %v148_v51  ;;  %v84_v3 = vld [vmem:[#allocation2 + $0x1e0] sm:$0xff]  ;;  %v536_v7 = vld [vmem:[#allocation2 + $0x8c8] sm:$0xff]  ;;  %v278_v9 = vld [vmem:[#allocation2 + $0x4d8] sm:$0xff] }
  0x61   :  { %v149_v4 = vld [vmem:[#allocation2 + $0x2e0] sm:$0xff]  ;;  %v502_v5 = vmax.f32 %v437_v58, %v470_v53  ;;  %v309_v8 = vmax.f32 %v244_v60, %v277_v56  ;;  %v116_v10 = vmax.f32 %v51_v2, %v84_v3  ;;  %v407_v12 = vld [vmem:[#allocation2 + $0x6d0] sm:$0xff]  ;;  %v343_v14 = vld [vmem:[#allocation2 + $0x5d8] sm:$0xff] }
  0x62   :  { %598 = vst [vmem:[#allocation5 + $0xb8] sm:$0xff] %v566_v63  ;;  %v438_v11 = vmax.f32 %v373_v0, %v406_v59  ;;  %v245_v13 = vmax.f32 %v180_v1, %v213_v62  ;;  %v214_v15 = vld [vmem:[#allocation2 + $0x3e0] sm:$0xff]  ;;  %v52_v19 = vld [vmem:[#allocation2 + $0xe8] sm:$0xff]  ;;  %v472_v23 = vld [vmem:[#allocation2 + $0x7d0] sm:$0xff] }
  0x63   :  { %v567_v16 = vmax.f32 %v502_v5, %v535_v54  ;;  %v374_v17 = vmax.f32 %v309_v8, %v342_v61  ;;  %v181_v18 = vmax.f32 %v116_v10, %v149_v4  ;;  %v85_v20 = vld [vmem:[#allocation2 + $0x1e8] sm:$0xff]  ;;  %v537_v24 = vld [vmem:[#allocation2 + $0x8d0] sm:$0xff]  ;;  %v279_v26 = vld [vmem:[#allocation2 + $0x4e0] sm:$0xff] }
  0x64   :  { %v150_v21 = vld [vmem:[#allocation2 + $0x2e8] sm:$0xff]  ;;  %v503_v22 = vmax.f32 %v438_v11, %v471_v6  ;;  %v310_v25 = vmax.f32 %v245_v13, %v278_v9  ;;  %v117_v27 = vmax.f32 %v52_v19, %v85_v20  ;;  %v408_v29 = vld [vmem:[#allocation2 + $0x6d8] sm:$0xff]  ;;  %v344_v31 = vld [vmem:[#allocation2 + $0x5e0] sm:$0xff] }
  0x65   :  { %599 = vst [vmem:[#allocation5 + $0xc0] sm:$0xff] %v567_v16  ;;  %v439_v28 = vmax.f32 %v374_v17, %v407_v12  ;;  %v246_v30 = vmax.f32 %v181_v18, %v214_v15  ;;  %v215_v32 = vld [vmem:[#allocation2 + $0x3e8] sm:$0xff]  ;;  %v53_v36 = vld [vmem:[#allocation2 + $0xf0] sm:$0xff]  ;;  %v473_v40 = vld [vmem:[#allocation2 + $0x7d8] sm:$0xff] }
  0x66   :  { %v568_v33 = vmax.f32 %v503_v22, %v536_v7  ;;  %v375_v34 = vmax.f32 %v310_v25, %v343_v14  ;;  %v182_v35 = vmax.f32 %v117_v27, %v150_v21  ;;  %v86_v37 = vld [vmem:[#allocation2 + $0x1f0] sm:$0xff]  ;;  %v538_v41 = vld [vmem:[#allocation2 + $0x8d8] sm:$0xff]  ;;  %v280_v43 = vld [vmem:[#allocation2 + $0x4e8] sm:$0xff] }
  0x67   :  { %v151_v38 = vld [vmem:[#allocation2 + $0x2f0] sm:$0xff]  ;;  %v504_v39 = vmax.f32 %v439_v28, %v472_v23  ;;  %v311_v42 = vmax.f32 %v246_v30, %v279_v26  ;;  %v118_v44 = vmax.f32 %v53_v36, %v86_v37  ;;  %v409_v46 = vld [vmem:[#allocation2 + $0x6e0] sm:$0xff]  ;;  %v345_v48 = vld [vmem:[#allocation2 + $0x5e8] sm:$0xff] }
  0x68   :  { %600 = vst [vmem:[#allocation5 + $0xc8] sm:$0xff] %v568_v33  ;;  %v440_v45 = vmax.f32 %v375_v34, %v408_v29  ;;  %v247_v47 = vmax.f32 %v182_v35, %v215_v32  ;;  %v216_v49 = vld [vmem:[#allocation2 + $0x3f0] sm:$0xff]  ;;  %v54_v53 = vld [vmem:[#allocation2 + $0xf8] sm:$0xff]  ;;  %v474_v57 = vld [vmem:[#allocation2 + $0x7e0] sm:$0xff] }
  0x69   :  { %v569_v50 = vmax.f32 %v504_v39, %v537_v24  ;;  %v376_v51 = vmax.f32 %v311_v42, %v344_v31  ;;  %v183_v52 = vmax.f32 %v118_v44, %v151_v38  ;;  %v87_v54 = vld [vmem:[#allocation2 + $0x1f8] sm:$0xff]  ;;  %v281_v59 = vld [vmem:[#allocation2 + $0x4f0] sm:$0xff]  ;;  %v410_v62 = vld [vmem:[#allocation2 + $0x6e8] sm:$0xff] }
  0x6a   :  { %v152_v55 = vld [vmem:[#allocation2 + $0x2f8] sm:$0xff]  ;;  %v505_v56 = vmax.f32 %v440_v45, %v473_v40  ;;  %v312_v58 = vmax.f32 %v247_v47, %v280_v43  ;;  %v119_v60 = vmax.f32 %v54_v53, %v87_v54  ;;  %v539_v2 = vld [vmem:[#allocation2 + $0x8e0] sm:$0xff]  ;;  %v346_v4 = vld [vmem:[#allocation2 + $0x5f0] sm:$0xff] }
  0x6b   :  { %601 = vst [vmem:[#allocation5 + $0xd0] sm:$0xff] %v569_v50  ;;  %v441_v61 = vmax.f32 %v376_v51, %v409_v46  ;;  %v248_v63 = vmax.f32 %v183_v52, %v216_v49  ;;  %v217_v0 = vld [vmem:[#allocation2 + $0x3f8] sm:$0xff]  ;;  %v475_v7 = vld [vmem:[#allocation2 + $0x7e8] sm:$0xff]  ;;  %v411_v11 = vld [vmem:[#allocation2 + $0x6f0] sm:$0xff] }
  0x6c   :  { %v570_v1 = vmax.f32 %v505_v56, %v538_v41  ;;  %v377_v3 = vmax.f32 %v312_v58, %v345_v48  ;;  %v184_v5 = vmax.f32 %v119_v60, %v152_v55  ;;  %v282_v9 = vld [vmem:[#allocation2 + $0x4f8] sm:$0xff]  ;;  %v540_v14 = vld [vmem:[#allocation2 + $0x8e8] sm:$0xff]  ;;  %v476_v18 = vld [vmem:[#allocation2 + $0x7f0] sm:$0xff] }
  0x6d   :  { %v506_v6 = vmax.f32 %v441_v61, %v474_v57  ;;  %v313_v8 = vmax.f32 %v248_v63, %v281_v59  ;;  %v347_v16 = vld [vmem:[#allocation2 + $0x5f8] sm:$0xff]  ;;  %v541_v23 = vld [vmem:[#allocation2 + $0x8f0] sm:$0xff] }
  0x6e   :  { %602 = vst [vmem:[#allocation5 + $0xd8] sm:$0xff] %v570_v1  ;;  %v442_v10 = vmax.f32 %v377_v3, %v410_v62  ;;  %v249_v12 = vmax.f32 %v184_v5, %v217_v0  ;;  %v412_v21 = vld [vmem:[#allocation2 + $0x6f8] sm:$0xff] }
  0x6f   :  { %v571_v13 = vmax.f32 %v506_v6, %v539_v2  ;;  %v378_v15 = vmax.f32 %v313_v8, %v346_v4  ;;  %v477_v26 = vld [vmem:[#allocation2 + $0x7f8] sm:$0xff] }
  0x70   :  { %v507_v17 = vmax.f32 %v442_v10, %v475_v7  ;;  %v314_v19 = vmax.f32 %v249_v12, %v282_v9  ;;  %v542_v29 = vld [vmem:[#allocation2 + $0x8f8] sm:$0xff] }
  0x71   :  { %603 = vst [vmem:[#allocation5 + $0xe0] sm:$0xff] %v571_v13  ;;  %v443_v20 = vmax.f32 %v378_v15, %v411_v11 }
  0x72   :  { %v572_v22 = vmax.f32 %v507_v17, %v540_v14  ;;  %v379_v24 = vmax.f32 %v314_v19, %v347_v16 }
  0x73   :  { %v508_v25 = vmax.f32 %v443_v20, %v476_v18 }
  0x74   :  { %604 = vst [vmem:[#allocation5 + $0xe8] sm:$0xff] %v572_v22  ;;  %v444_v27 = vmax.f32 %v379_v24, %v412_v21 }
  0x75   :  { %v573_v28 = vmax.f32 %v508_v25, %v541_v23 }
  0x76   :  { %v509_v30 = vmax.f32 %v444_v27, %v477_v26 }
  0x77   :  { %605 = vst [vmem:[#allocation5 + $0xf0] sm:$0xff] %v573_v28 }
  0x78   :  { %v574_v31 = vmax.f32 %v509_v30, %v542_v29 }
  0x7a   :  { %606 = vst [vmem:[#allocation5 + $0xf8] sm:$0xff] %v574_v31 }
  0x7b   :  { %659 = shalt.err (!%p656_p9)
}
  0x7c   :  { %618 = dma.vmem_to_hbm [thread:$0]  %s613_s13, 4096, %s699_s1, [#allocation4], %s673_s9, %s673_s9, %s674_s10  }
  0x7d   :  { %670 = dma.done.wait [#allocation4], 4096  }
  0x7e   :  { %671 = vsyncadd [#allocation4], 4294963200 }
  0x7f   :  { %622 = vsyncpa [#allocation3], 1 }
  0x80   :  { %623 = vsyncpa [#allocation4], 1 }

</bundles_post_ra>
